<compile_context>
chip_gen: v6e
topology: v6e:2x2x1
jax: 0.10.0
libtpu: 0.0.40
codegen_flags: <defaults>
</compile_context>

<pallas_src>
import functools
import math

import jax
import jax.numpy as jnp
from jax.experimental import pallas as pl
from jax.experimental.pallas import tpu as pltpu


_LN_EPS = 1e-12


# ---------------------------------------------------------------------------
# Generation-aware VMEM budget and matmul tile preferences
# ---------------------------------------------------------------------------
def _query_vmem_capacity():
    try:
        return int(pltpu.get_tpu_info().vmem_capacity_bytes)
    except Exception:
        # Conservative fallback (assume the smallest per-TC VMEM, v7x-like).
        return 64 * 1024 * 1024


_VMEM_CAP = _query_vmem_capacity()
if _VMEM_CAP >= 100 * 1024 * 1024:          # v5e / v6e: 128 MiB physical
    _VMEM_LIMIT = 96 * 1024 * 1024
    _MM_TILES = (1024, 1536, 768)           # (tm, tn, tk) preferences
else:                                        # v7x: 64 MiB physical per TC
    _VMEM_LIMIT = 40 * 1024 * 1024
    _MM_TILES = (768, 1024, 512)


def _mosaic_params(dimension_semantics):
    return pltpu.CompilerParams(dimension_semantics=dimension_semantics,
                                vmem_limit_bytes=_VMEM_LIMIT)


def _pick_tile(dim, pref, align):
    """Largest divisor of `dim` that is <= pref and a multiple of `align`.

    Falls back to the full dimension only if no aligned divisor exists (then
    the block equals the array extent, which is always legal)."""
    if dim <= pref:
        return dim
    t = (pref // align) * align
    while t >= align:
        if dim % t == 0:
            return t
        t -= align
    # TODO(synk): pad the array instead of full-dim fallback for pathological dims.
    return dim


# ---------------------------------------------------------------------------
# Tiled linear kernel (bias + optional activation epilogue).
# Optionally writes a "sectioned" output [n_sections, M, N/n_sections] so the
# fused QKV projection lands head/section-major with no XLA transpose.
# ---------------------------------------------------------------------------
def _linear_kernel(x_ref, w_ref, b_ref, o_ref, acc_ref, *, act):
    k = pl.program_id(2)

    @pl.when(k == 0)
    def _init():
        acc_ref[...] = jnp.zeros_like(acc_ref)

    acc_ref[...] += jnp.dot(x_ref[...], w_ref[...],
                            preferred_element_type=jnp.float32)

    @pl.when(k == pl.num_programs(2) - 1)
    def _epilogue():
        y = acc_ref[...] + b_ref[...]
        if act == "gelu":
            # tanh approximation of GELU (elementwise math kept in f32).
            y = 0.5 * y * (1.0 + jnp.tanh(
                0.7978845608028654 * (y + 0.044715 * y * y * y)))
        elif act == "tanh":
            y = jnp.tanh(y)
        o_ref[...] = y.reshape(o_ref.shape).astype(o_ref.dtype)


def pallas_linear(x, w, b, act="none", out_dtype=jnp.bfloat16,
                  out_sections=1, tiles=None):
    M, K = x.shape
    _, N = w.shape
    tm_p, tn_p, tk_p = tiles or _MM_TILES
    Ns = N // out_sections                      # columns per section
    tm = _pick_tile(M, tm_p, 8)
    tn = _pick_tile(Ns, tn_p, 128)              # never straddles a section
    tk = _pick_tile(K, tk_p, 128)
    nj_sec = Ns // tn
    grid = (M // tm, N // tn, K // tk)

    if out_sections == 1:
        out_shape = jax.ShapeDtypeStruct((M, N), out_dtype)
        out_spec = pl.BlockSpec((tm, tn), lambda i, j, k: (i, j))
    else:
        out_shape = jax.ShapeDtypeStruct((out_sections, M, Ns), out_dtype)
        out_spec = pl.BlockSpec(
            (1, tm, tn), lambda i, j, k: (j // nj_sec, i, j % nj_sec))

    return pl.pallas_call(
        functools.partial(_linear_kernel, act=act),
        grid=grid,
        in_specs=[
            pl.BlockSpec((tm, tk), lambda i, j, k: (i, k)),
            pl.BlockSpec((tk, tn), lambda i, j, k: (k, j)),
            pl.BlockSpec((1, tn), lambda i, j, k: (0, j)),
        ],
        out_specs=out_spec,
        out_shape=out_shape,
        scratch_shapes=[pltpu.VMEM((tm, tn), jnp.float32)],
        compiler_params=_mosaic_params(("parallel", "parallel", "arbitrary")),
    )(x, w, b.reshape(1, N))


# ---------------------------------------------------------------------------
# Tiled linear + residual-add + LayerNorm fused epilogue (N = full hidden)
# ---------------------------------------------------------------------------
def _linear_res_ln_kernel(x_ref, w_ref, b_ref, res_ref, g_ref, be_ref,
                          o_ref, acc_ref):
    k = pl.program_id(1)

    @pl.when(k == 0)
    def _init():
        acc_ref[...] = jnp.zeros_like(acc_ref)

    acc_ref[...] += jnp.dot(x_ref[...], w_ref[...],
                            preferred_element_type=jnp.float32)

    @pl.when(k == pl.num_programs(1) - 1)
    def _epilogue():
        y = acc_ref[...] + b_ref[...] + res_ref[...].astype(jnp.float32)
        mu = jnp.mean(y, axis=-1, keepdims=True)
        var = jnp.mean((y - mu) ** 2, axis=-1, keepdims=True)
        yn = (y - mu) * jax.lax.rsqrt(var + _LN_EPS)
        o_ref[...] = (yn * g_ref[...] + be_ref[...]).astype(o_ref.dtype)


def pallas_linear_res_ln(x, w, b, residual, gamma, beta,
                         out_dtype=jnp.bfloat16, tm=1024, tk=None):
    M, K = x.shape
    _, N = w.shape                       # N = hidden size, kept untiled for LN
    tk = tk or _MM_TILES[2]
    tm = _pick_tile(M, tm, 8)
    tk = _pick_tile(K, tk, 128)
    grid = (M // tm, K // tk)
    return pl.pallas_call(
        _linear_res_ln_kernel,
        grid=grid,
        in_specs=[
            pl.BlockSpec((tm, tk), lambda i, k: (i, k)),
            pl.BlockSpec((tk, N), lambda i, k: (k, 0)),
            pl.BlockSpec((1, N), lambda i, k: (0, 0)),
            pl.BlockSpec((tm, N), lambda i, k: (i, 0)),
            pl.BlockSpec((1, N), lambda i, k: (0, 0)),
            pl.BlockSpec((1, N), lambda i, k: (0, 0)),
        ],
        out_specs=pl.BlockSpec((tm, N), lambda i, k: (i, 0)),
        out_shape=jax.ShapeDtypeStruct((M, N), out_dtype),
        scratch_shapes=[pltpu.VMEM((tm, N), jnp.float32)],
        compiler_params=_mosaic_params(("parallel", "arbitrary")),
    )(x, w, b.reshape(1, N), residual, gamma.reshape(1, N), beta.reshape(1, N))


# ---------------------------------------------------------------------------
# Standalone LayerNorm (embeddings)
# ---------------------------------------------------------------------------
def _layernorm_kernel(x_ref, g_ref, b_ref, o_ref):
    x = x_ref[...].astype(jnp.float32)
    mu = jnp.mean(x, axis=-1, keepdims=True)
    var = jnp.mean((x - mu) ** 2, axis=-1, keepdims=True)
    y = (x - mu) * jax.lax.rsqrt(var + _LN_EPS)
    o_ref[...] = (y * g_ref[...] + b_ref[...]).astype(o_ref.dtype)


def pallas_layernorm(x, gamma, beta, out_dtype=jnp.bfloat16, tm=1024):
    M, H = x.shape
    tm = _pick_tile(M, tm, 8)
    return pl.pallas_call(
        _layernorm_kernel,
        grid=(M // tm,),
        in_specs=[
            pl.BlockSpec((tm, H), lambda i: (i, 0)),
            pl.BlockSpec((1, H), lambda i: (0, 0)),
            pl.BlockSpec((1, H), lambda i: (0, 0)),
        ],
        out_specs=pl.BlockSpec((tm, H), lambda i: (i, 0)),
        out_shape=jax.ShapeDtypeStruct((M, H), out_dtype),
        compiler_params=_mosaic_params(("parallel",)),
    )(x, gamma.reshape(1, H), beta.reshape(1, H))


# ---------------------------------------------------------------------------
# Flash-attention kernel.
#
# Reads q/k/v directly from the sectioned QKV projection output
# qkv3: [3, B, S, H] (the same array is passed three times; the leading block
# index 0/1/2 selects q/k/v), so no head split/merge transposes are needed.
# All heads of a (batch, q-tile) are processed per grid step: loads and the
# output store are full-H (128-lane dense); per-head online-softmax state is
# kept in (nH, tq, *) VMEM scratch.  The 1/sqrt(dH) scale is pre-folded into
# the Q columns of w_qkv.
# ---------------------------------------------------------------------------
def _flash_attn_kernel(q_ref, k_ref, v_ref, mask_ref, o_ref,
                       m_sc, l_sc, acc_sc, *, num_heads, head_dim):
    ki = pl.program_id(2)

    @pl.when(ki == 0)
    def _init():
        m_sc[...] = jnp.full_like(m_sc, -1e30)
        l_sc[...] = jnp.zeros_like(l_sc)
        acc_sc[...] = jnp.zeros_like(acc_sc)

    q = q_ref[0, 0]                  # [tq,  H] bf16 (already scaled)
    k = k_ref[0, 0]                  # [tkv, H] bf16
    v = v_ref[0, 0]                  # [tkv, H] bf16
    mask = mask_ref[0]               # [1, tkv] f32 additive

    for h in range(num_heads):
        lo = h * head_dim
        qh = q[:, lo:lo + head_dim]
        kh = k[:, lo:lo + head_dim]
        vh = v[:, lo:lo + head_dim]

        s = jax.lax.dot_general(qh, kh, (((1,), (1,)), ((), ())),
                                preferred_element_type=jnp.float32)
        s = s + mask                                  # [tq,tkv] + [1,tkv]

        m_prev = m_sc[h]                              # [tq, 1]
        m_new = jnp.maximum(m_prev, jnp.max(s, axis=-1, keepdims=True))
        alpha = jnp.exp(m_prev - m_new)
        p = jnp.exp(s - m_new)
        l_sc[h] = alpha * l_sc[h] + jnp.sum(p, axis=-1, keepdims=True)
        pv = jax.lax.dot_general(p.astype(vh.dtype), vh,
                                 (((1,), (0,)), ((), ())),
                                 preferred_element_type=jnp.float32)
        acc_sc[h] = alpha * acc_sc[h] + pv
        m_sc[h] = m_new

    @pl.when(ki == pl.num_programs(2) - 1)
    def _finalize():
        outs = []
        for h in range(num_heads):
            inv_l = pl.reciprocal(l_sc[h], approx=True)
            outs.append(acc_sc[h] * inv_l)
        # Single lane-dense [tq, H] store (heads concatenated along lanes).
        o_ref[0] = jnp.concatenate(outs, axis=-1).astype(o_ref.dtype)


def pallas_flash_attention(qkv3, mask, num_heads, tq=256, tkv=256):
    # qkv3: [3, B, S, H] (sectioned QKV projection output), mask: [B, 1, S].
    _, B, S, H = qkv3.shape
    dH = H // num_heads
    tq = _pick_tile(S, tq, 8)
    tkv = _pick_tile(S, tkv, 128)     # last dim of the mask block
    grid = (B, S // tq, S // tkv)
    return pl.pallas_call(
        functools.partial(_flash_attn_kernel, num_heads=num_heads, head_dim=dH),
        grid=grid,
        in_specs=[
            pl.BlockSpec((1, 1, tq, H), lambda b, qi, ki: (0, b, qi, 0)),
            pl.BlockSpec((1, 1, tkv, H), lambda b, qi, ki: (1, b, ki, 0)),
            pl.BlockSpec((1, 1, tkv, H), lambda b, qi, ki: (2, b, ki, 0)),
            pl.BlockSpec((1, 1, tkv), lambda b, qi, ki: (b, 0, ki)),
        ],
        out_specs=pl.BlockSpec((1, tq, H), lambda b, qi, ki: (b, qi, 0)),
        out_shape=jax.ShapeDtypeStruct((B, S, H), jnp.bfloat16),
        scratch_shapes=[
            pltpu.VMEM((num_heads, tq, 1), jnp.float32),     # m
            pltpu.VMEM((num_heads, tq, 1), jnp.float32),     # l
            pltpu.VMEM((num_heads, tq, dH), jnp.float32),    # acc
        ],
        compiler_params=_mosaic_params(("parallel", "parallel", "arbitrary")),
    )(qkv3, qkv3, qkv3, mask)


# ---------------------------------------------------------------------------
# Fused start/end head ([H,4] matmul) + weighted cross-entropy reduction.
# Avoids writing/re-reading an [M,4] logits array (lane-width-4 stores).
# ---------------------------------------------------------------------------
def _head_ce_kernel(x_ref, w_ref, b_ref, sp_ref, ep_ref, loss_ref, acc_ref,
                    *, inv_count, w_start, w_end):
    mi = pl.program_id(0)

    @pl.when(mi == 0)
    def _init():
        acc_ref[...] = jnp.zeros_like(acc_ref)

    logits = jnp.dot(x_ref[...], w_ref[...],
                     preferred_element_type=jnp.float32) + b_ref[...]   # [tm,4]
    sp = sp_ref[...]                                                    # [tm,1]
    ep = ep_ref[...]

    def ce_sum(lg, lab):
        m = jnp.max(lg, axis=-1, keepdims=True)
        lse = m + jnp.log(jnp.sum(jnp.exp(lg - m), axis=-1, keepdims=True))
        picked = jnp.where(lab == 0, lg[:, 0:1], lg[:, 1:2])
        return jnp.sum(lse - picked, axis=0, keepdims=True)             # [1,1]

    s_sum = ce_sum(logits[:, 0:2], sp)
    e_sum = ce_sum(logits[:, 2:4], ep)
    acc_ref[...] += w_start * s_sum + w_end * e_sum

    @pl.when(mi == pl.num_programs(0) - 1)
    def _finalize():
        loss_ref[...] = acc_ref[...] * inv_count


def pallas_head_ce_loss(x, head_w, head_b, start_pos, end_pos,
                        w_start, w_end, tm=1024):
    M, H = x.shape
    tm = _pick_tile(M, tm, 8)
    return pl.pallas_call(
        functools.partial(_head_ce_kernel, inv_count=1.0 / M,
                          w_start=float(w_start), w_end=float(w_end)),
        grid=(M // tm,),
        in_specs=[
            pl.BlockSpec((tm, H), lambda i: (i, 0)),
            pl.BlockSpec((H, 4), lambda i: (0, 0)),
            pl.BlockSpec((1, 4), lambda i: (0, 0)),
            pl.BlockSpec((tm, 1), lambda i: (i, 0)),
            pl.BlockSpec((tm, 1), lambda i: (i, 0)),
        ],
        out_specs=pl.BlockSpec((1, 1), lambda i: (0, 0)),
        out_shape=jax.ShapeDtypeStruct((1, 1), jnp.float32),
        scratch_shapes=[pltpu.VMEM((1, 1), jnp.float32)],
        compiler_params=_mosaic_params(("arbitrary",)),
    )(x, head_w, head_b.reshape(1, 4),
      start_pos.reshape(M, 1).astype(jnp.int32),
      end_pos.reshape(M, 1).astype(jnp.int32))


# ---------------------------------------------------------------------------
# BERT encoder + BertQueryNER (plain-JAX orchestration around Pallas kernels)
# ---------------------------------------------------------------------------
def bert_forward(params, input_ids, token_type_ids, attention_mask, cfg,
                 compute_pooled=False):
    B, S = input_ids.shape
    H, nH = cfg["hidden_size"], cfg["num_heads"]
    M = B * S

    # Embedding gather is glue (no clean Pallas gather path at this scale).
    emb = (jnp.take(params["word_emb"], input_ids, axis=0)
           + params["pos_emb"][None, :S, :]
           + jnp.take(params["type_emb"], token_type_ids, axis=0))
    x = pallas_layernorm(emb.reshape(M, H), params["emb_ln_g"],
                         params["emb_ln_b"])                      # bf16 [M,H]

    # Additive attention mask, per batch only: [B, 1, S].
    ext_mask = ((1.0 - attention_mask.astype(jnp.float32)) * -10000.0)[:, None, :]

    for layer in params["layers"]:
        # Fused QKV projection writing a sectioned [3, M, H] output directly
        # (no XLA transpose; the softmax scale lives in the Q weight columns).
        qkv = pallas_linear(x, layer["w_qkv"], layer["b_qkv"],
                            out_sections=3)                       # [3, M, H]
        ctx = pallas_flash_attention(qkv.reshape(3, B, S, H), ext_mask, nH)
        # ctx is token-major [B, S, H]: feeds the output projection directly.
        x = pallas_linear_res_ln(ctx.reshape(M, H), layer["wo"], layer["bo"],
                                 x, layer["ln1_g"], layer["ln1_b"])
        # FFN: W1 + GELU, then W2 + residual + LayerNorm fused.
        h = pallas_linear(x, layer["w1"], layer["b1"], act="gelu")
        x = pallas_linear_res_ln(h, layer["w2"], layer["b2"],
                                 x, layer["ln2_g"], layer["ln2_b"])

    sequence_output = x.reshape(B, S, H)
    pooled_output = None
    if compute_pooled:   # unused by the NER heads; skipped by default
        pooled_output = pallas_linear(sequence_output[:, 0, :],
                                      params["pool_w"], params["pool_b"],
                                      act="tanh")
    return sequence_output, pooled_output


def bert_query_ner_forward(params, cfg, input_ids, token_type_ids=None,
                           attention_mask=None, start_positions=None,
                           end_positions=None, span_positions=None):
    B, S = input_ids.shape
    H = cfg["hidden_size"]
    if token_type_ids is None:
        token_type_ids = jnp.zeros_like(input_ids)
    if attention_mask is None:
        attention_mask = jnp.ones_like(input_ids)

    sequence_output, _pooled = bert_forward(params, input_ids, token_type_ids,
                                            attention_mask, cfg,
                                            compute_pooled=False)
    seq_flat = sequence_output.reshape(B * S, H)

    if start_positions is not None and end_positions is not None:
        # loss_ws == 0 in the reference module, so the span branch is inactive.
        # Head matmul + weighted CE fused in a single kernel.
        # TODO(synk): fold this into the final layer's res+LN epilogue to avoid
        # re-reading the [M,H] sequence output from HBM.
        loss = pallas_head_ce_loss(seq_flat, params["head_w"], params["head_b"],
                                   start_positions, end_positions,
                                   cfg["weight_start"], cfg["weight_end"])
        return loss[0, 0]
    else:
        # Fused start/end heads: single [H,4] matmul ([:, :2] start, [:, 2:] end).
        logits = pallas_linear(seq_flat, params["head_w"], params["head_b"],
                               out_dtype=jnp.float32)
        start_logits = logits[:, 0:2].reshape(B, S, 2)
        end_logits = logits[:, 2:4].reshape(B, S, 2)
        span_logits = jnp.ones((B, S, S), jnp.float32)  # torch.ones(...) path
        return start_logits, end_logits, span_logits


# ---------------------------------------------------------------------------
# Deterministic synthetic parameters (weights bf16, biases / LN params f32)
# ---------------------------------------------------------------------------
def init_params(key, cfg):
    H, I = cfg["hidden_size"], cfg["intermediate_size"]
    V, P, T = cfg["vocab_size"], cfg["max_position"], cfg["type_vocab_size"]
    dH = H // cfg["num_heads"]
    scale = 1.0 / math.sqrt(dH)

    def nrm_f32(k, shape):
        return 0.02 * jax.random.normal(k, shape, jnp.float32)

    def nrm(k, shape, dtype=jnp.bfloat16):
        return nrm_f32(k, shape).astype(dtype)

    keys = iter(jax.random.split(key, 8 + 10 * cfg["num_layers"]))
    params = {
        "word_emb": nrm(next(keys), (V, H), jnp.float32),
        "pos_emb": nrm(next(keys), (P, H), jnp.float32),
        "type_emb": nrm(next(keys), (T, H), jnp.float32),
        "emb_ln_g": jnp.ones((H,), jnp.float32),
        "emb_ln_b": jnp.zeros((H,), jnp.float32),
        "pool_w": nrm(next(keys), (H, H)),
        "pool_b": jnp.zeros((H,), jnp.float32),
        # Fused start/end head weight == concat([W_start, W_end], axis=1).
        "head_w": nrm(next(keys), (H, 4)),
        "head_b": jnp.zeros((4,), jnp.float32),
        "layers": [],
    }
    for _ in range(cfg["num_layers"]):
        # Fused QKV weight with the 1/sqrt(dH) softmax scale folded into the
        # Q columns (and Q bias, here zero) at weight-load time.
        wq = nrm_f32(next(keys), (H, H)) * scale
        wk = nrm_f32(next(keys), (H, H))
        wv = nrm_f32(next(keys), (H, H))
        w_qkv = jnp.concatenate([wq, wk, wv], axis=1).astype(jnp.bfloat16)
        params["layers"].append({
            "w_qkv": w_qkv,
            "b_qkv": jnp.zeros((3 * H,), jnp.float32),
            "wo": nrm(next(keys), (H, H)), "bo": jnp.zeros((H,), jnp.float32),
            "ln1_g": jnp.ones((H,), jnp.float32),
            "ln1_b": jnp.zeros((H,), jnp.float32),
            "w1": nrm(next(keys), (H, I)), "b1": jnp.zeros((I,), jnp.float32),
            "w2": nrm(next(keys), (I, H)), "b2": jnp.zeros((H,), jnp.float32),
            "ln2_g": jnp.ones((H,), jnp.float32),
            "ln2_b": jnp.zeros((H,), jnp.float32),
        })
    return params


# TODO(synk): pretrained-checkpoint loading (self.bert.from_pretrained) is replaced
# by deterministic random init; dropout is omitted (eval semantics); GELU uses
# the tanh approximation; cross-call weight prefetch (P10) not implemented.

if __name__ == "__main__":
    cfg = dict(hidden_size=32, num_heads=4, num_layers=2, intermediate_size=64,
               vocab_size=50, max_position=16, type_vocab_size=2,
               weight_start=1.0, weight_end=1.0)

    key = jax.random.PRNGKey(0)
    k_par, k_ids, k_sp, k_ep = jax.random.split(key, 4)
    params = init_params(k_par, cfg)

    B, S = 2, 8
    input_ids = jax.random.randint(k_ids, (B, S), 0, cfg["vocab_size"], dtype=jnp.int32)
    token_type_ids = jnp.zeros((B, S), jnp.int32)
    attention_mask = jnp.ones((B, S), jnp.int32)
    start_positions = jax.random.randint(k_sp, (B, S), 0, 2, dtype=jnp.int32)
    end_positions = jax.random.randint(k_ep, (B, S), 0, 2, dtype=jnp.int32)

    # Training path: weighted cross-entropy loss (scalar).
    loss = bert_query_ner_forward(params, cfg, input_ids, token_type_ids,
                                  attention_mask, start_positions, end_positions)
    loss = jax.block_until_ready(loss)

    # Inference path: (start_logits, end_logits, span_logits).
    sl, el, sp = bert_query_ner_forward(params, cfg, input_ids, token_type_ids,
                                        attention_mask)
    jax.block_until_ready(sl); jax.block_until_ready(el); jax.block_until_ready(sp)

    assert sl.shape == (B, S, 2) and el.shape == (B, S, 2) and sp.shape == (B, S, S)
    assert loss.shape == () and bool(jnp.isfinite(loss))
    print("KERNEL_OK")
</pallas_src>

<mosaic_0001>
module attributes {stable_mosaic.version = 11 : i64} {
  func.func @_layernorm_kernel(%arg0: i32, %arg1: memref<16x32xf32, #tpu.memory_space<vmem>>, %arg2: memref<1x32xf32, #tpu.memory_space<vmem>>, %arg3: memref<1x32xf32, #tpu.memory_space<vmem>>, %arg4: memref<16x32xbf16, #tpu.memory_space<vmem>>) attributes {dimension_semantics = [#tpu.dimension_semantics<parallel>], iteration_bounds = array<i64: 1>, scalar_prefetch = 0 : i64, scratch_operands = 0 : i64, tpu.core_type = #tpu.core_type<tc>, window_params = [{transform_indices = @transform_0, window_bounds = array<i64: 16, 32>}, {pipeline_mode = #tpu.pipeline_mode<synchronous>, transform_indices = @transform_1, window_bounds = array<i64: 1, 32>}, {pipeline_mode = #tpu.pipeline_mode<synchronous>, transform_indices = @transform_2, window_bounds = array<i64: 1, 32>}, {transform_indices = @transform_3, window_bounds = array<i64: 16, 32>}]} {
    %c0 = arith.constant 0 : index
    %c0_0 = arith.constant 0 : index
    %0 = vector.load %arg1[%c0, %c0_0] : memref<16x32xf32, #tpu.memory_space<vmem>>, vector<16x32xf32>
    %cst = arith.constant dense<0.000000e+00> : vector<16xf32>
    %1 = vector.multi_reduction <add>, %0, %cst [1] : vector<16x32xf32> to vector<16xf32>
    %2 = vector.shape_cast %1 : vector<16xf32> to vector<16x1xf32>
    %cst_1 = arith.constant 3.200000e+01 : f32
    %3 = vector.broadcast %cst_1 : f32 to vector<16x1xf32>
    %4 = arith.divf %2, %3 : vector<16x1xf32>
    %5 = vector.broadcast %4 : vector<16x1xf32> to vector<16x32xf32>
    %6 = arith.subf %0, %5 : vector<16x32xf32>
    %7 = arith.mulf %6, %6 : vector<16x32xf32>
    %cst_2 = arith.constant dense<0.000000e+00> : vector<16xf32>
    %8 = vector.multi_reduction <add>, %7, %cst_2 [1] : vector<16x32xf32> to vector<16xf32>
    %9 = vector.shape_cast %8 : vector<16xf32> to vector<16x1xf32>
    %cst_3 = arith.constant 3.200000e+01 : f32
    %10 = vector.broadcast %cst_3 : f32 to vector<16x1xf32>
    %11 = arith.divf %9, %10 : vector<16x1xf32>
    %12 = vector.broadcast %4 : vector<16x1xf32> to vector<16x32xf32>
    %13 = arith.subf %0, %12 : vector<16x32xf32>
    %cst_4 = arith.constant 9.99999996E-13 : f32
    %14 = vector.broadcast %cst_4 : f32 to vector<16x1xf32>
    %15 = arith.addf %11, %14 : vector<16x1xf32>
    %16 = math.rsqrt %15 : vector<16x1xf32>
    %17 = vector.broadcast %16 : vector<16x1xf32> to vector<16x32xf32>
    %18 = arith.mulf %13, %17 : vector<16x32xf32>
    %c0_5 = arith.constant 0 : index
    %c0_6 = arith.constant 0 : index
    %19 = vector.load %arg2[%c0_5, %c0_6] : memref<1x32xf32, #tpu.memory_space<vmem>>, vector<1x32xf32>
    %20 = vector.broadcast %19 : vector<1x32xf32> to vector<16x32xf32>
    %21 = arith.mulf %18, %20 : vector<16x32xf32>
    %c0_7 = arith.constant 0 : index
    %c0_8 = arith.constant 0 : index
    %22 = vector.load %arg3[%c0_7, %c0_8] : memref<1x32xf32, #tpu.memory_space<vmem>>, vector<1x32xf32>
    %23 = vector.broadcast %22 : vector<1x32xf32> to vector<16x32xf32>
    %24 = arith.addf %21, %23 : vector<16x32xf32>
    %25 = arith.truncf %24 : vector<16x32xf32> to vector<16x32xbf16>
    %c0_9 = arith.constant 0 : index
    %c0_10 = arith.constant 0 : index
    %26 = vector.load %arg4[%c0_9, %c0_10] : memref<16x32xbf16, #tpu.memory_space<vmem>>, vector<16x32xbf16>
    tpu.vector_store %arg4[%c0_9, %c0_10], %25 {strides = array<i32>} : memref<16x32xbf16, #tpu.memory_space<vmem>>, vector<16x32xbf16>,
    return
  }
  func.func @transform_0(%arg0: i32) -> (i32, i32) {
    %c0_i32 = arith.constant 0 : i32
    %c0_i32_0 = arith.constant 0 : i32
    return %arg0, %c0_i32 : i32, i32
  }
  func.func @transform_1(%arg0: i32) -> (i32, i32) {
    %c0_i32 = arith.constant 0 : i32
    %c0_i32_0 = arith.constant 0 : i32
    %c0_i32_1 = arith.constant 0 : i32
    return %c0_i32, %c0_i32_0 : i32, i32
  }
  func.func @transform_2(%arg0: i32) -> (i32, i32) {
    %c0_i32 = arith.constant 0 : i32
    %c0_i32_0 = arith.constant 0 : i32
    %c0_i32_1 = arith.constant 0 : i32
    return %c0_i32, %c0_i32_0 : i32, i32
  }
  func.func @transform_3(%arg0: i32) -> (i32, i32) {
    %c0_i32 = arith.constant 0 : i32
    %c0_i32_0 = arith.constant 0 : i32
    return %arg0, %c0_i32 : i32, i32
  }
}

</mosaic_0001>

<bundles_post_ra>
// kernel: tpu_custom_call.1
= control target key start
LH: loop header
LB: loop body
LE: loop exit
PB: predicated region body
PF: predicated region fallthrough
CT: control target
= control target key end

     0   :  { %8 = vsyncpa [#allocation3], 0  ;;  %s207_s0 = inlined_call_operand.hbm [shape: f32[16,32], index: 0, kind: input, shape index: {}]   ;;  %s208_s1 = inlined_call_operand.vmem [shape: f32[1,32], index: 1, kind: input, shape index: {}]   ;;  %s209_s2 = inlined_call_operand.vmem [shape: f32[1,32], index: 2, kind: input, shape index: {}]   ;;  %s210_s3 = inlined_call_operand.hbm [shape: bf16[16,32], index: 3, kind: output, shape index: {}]  }
   0x1   :  { %9 = vsyncpa [#allocation4], 0  ;;  %s165_s12 = smov [#allocation2]  }
   0x2   :  { %s15_s13 = sshll.u32 %s165_s12, 4  ;;  %s16_s13 = int_to_ptr.vmem [resolvable:$true] %s15_s13 }
   0x3   :  { %s129_s14 = scalar_lea.vmem %s16_s13, 256  ;;  %p134_p1 = scmp.lt.s32.totalorder %s16_s13, %s16_s13 }
   0x4   :  { %p130_p0 = scmp.ne.s32.totalorder %s16_s13, %s129_s14  ;;  %p135_p2 = scmp.lt.s32.totalorder %s129_s14, %s129_s14 }
   0x6   :  { %p136_p3 = por %p135_p2, %p134_p1 }
   0x8   :  { %p137_p4 = pnand %p136_p3, %p130_p0 }
   0xa   :  { %140 = shalt.err (!%p137_p4)
}
   0xb   :  { %s166_s15 = smov 128   ;;  %s167_s16 = smov 8  }
   0xc   :  { %21 = dma.hbm_to_vmem [thread:$0]  %s207_s0, 256, %s16_s13, [#allocation3], %s166_s15, %s166_s15, %s167_s16  }
   0xd   :  { %161 = dma.done.wait [#allocation3], 256  }
   0xe   :  { %162 = vsyncadd [#allocation3], 4294967040  ;;  %vm31_vm0 = vcmask 261120   ;;  %v29_v0 = vld [vmem:[#allocation2] sm:$0xff]  ;;  %v30_v1 = vld [vmem:[#allocation2 + $0x8] sm:$0xff]  ;;  %vm85_vm1 = vcmask 257024  }
   0xf   :  { %v32_v2 = vsel %vm31_vm0, %v29_v0, 0.0  ;;  %v35_v3 = vsel %vm31_vm0, %v30_v1, 0.0  ;;  %v105_v21 = vld [vmem:[%s208_s1] ss:$0 sm:$0xff]  ;;  %s168_s22 = smov [#allocation5]  }
  0x10   :  { %33 = vadd.xlane.f32.xlu0 %v32_v2  ;;  %v106_v23 = vld [vmem:[%s209_s2] ss:$0 sm:$0xff]  ;;  %s93_s23 = sshll.u32 %s168_s22, 4  ;;  %s94_s23 = int_to_ptr.vmem [resolvable:$true] %s93_s23 }
  0x11   :  { %s141_s1 = scalar_lea.vmem %s94_s23, 128  ;;  %p146_p6 = scmp.lt.s32.totalorder %s94_s23, %s94_s23 }
  0x12   :  { %p142_p5 = scmp.ne.s32.totalorder %s94_s23, %s141_s1  ;;  %p147_p7 = scmp.lt.s32.totalorder %s141_s1, %s141_s1 }
  0x14   :  { %36 = vadd.xlane.f32.xlu0 %v35_v3  ;;  %p148_p8 = por %p147_p7, %p146_p6 }
  0x16   :  { %p149_p9 = pnand %p148_p8, %p142_p5 }
  0x99   :  { %v34_v4 = vpop.xlane.xlu0 %33 }
  0x9a   :  { %v39_v5 = vmul.f32 0.03125, %v34_v4 }
  0x9c   :  { %v41_v6 = vsub.f32 %v29_v0, %v39_v5 }
  0x9d   :  { %v37_v7 = vpop.xlane.xlu0 %36 }
  0x9e   :  { %v40_v8 = vmul.f32 0.03125, %v37_v7  ;;  %v43_v9 = vmul.f32 %v41_v6, %v41_v6 }
  0xa0   :  { %v42_v10 = vsub.f32 %v30_v1, %v40_v8  ;;  %v45_v11 = vsel %vm31_vm0, %v43_v9, 0.0 }
  0xa1   :  { %46 = vadd.xlane.f32.xlu1 %v45_v11 }
  0xa2   :  { %v44_v12 = vmul.f32 %v42_v10, %v42_v10 }
  0xa4   :  { %v48_v13 = vsel %vm31_vm0, %v44_v12, 0.0 }
  0xa5   :  { %49 = vadd.xlane.f32.xlu1 %v48_v13 }
 0x12a   :  { %v47_v14 = vpop.xlane.xlu1 %46 }
 0x12b   :  { %v51_v15 = vmul.f32 0.03125, %v47_v14 }
 0x12d   :  { %v53_v16 = vadd.f32 1e-12, %v51_v15 }
 0x12e   :  { %v50_v17 = vpop.xlane.xlu1 %49 }
 0x12f   :  { %117 = vrsqrt.f32 %v53_v16  ;;  %v52_v18 = vmul.f32 0.03125, %v50_v17 }
 0x131   :  { %v54_v19 = vadd.f32 1e-12, %v52_v18 }
 0x133   :  { %119 = vrsqrt.f32 %v54_v19 }
 0x13c   :  { %v118_v20 = vpop.eup %117 }
 0x13d   :  { %v57_v22 = vmul.f32 %v118_v20, %v41_v6 }
 0x13f   :  { %v66_v24 = vmul.f32 %v105_v21, %v57_v22 }
 0x140   :  { %v120_v25 = vpop.eup %119 }
 0x141   :  { %v58_v26 = vmul.f32 %v120_v25, %v42_v10  ;;  %v75_v27 = vadd.f32 %v106_v23, %v66_v24 }
 0x143   :  { %v67_v28 = vmul.f32 %v105_v21, %v58_v26  ;;  %v109_v29 = vpack.c.bf16 %v75_v27, %v75_v27 }
 0x145   :  { %v76_v30 = vadd.f32 %v106_v23, %v67_v28  ;;  %86 = vst.msk [vmem:[#allocation5] sm:$0xf] %vm85_vm1, %v109_v29 }
 0x147   :  { %v110_v31 = vpack.c.bf16 %v76_v30, %v76_v30 }
 0x149   :  { %87 = vst.msk [vmem:[#allocation5 + $0x4] sm:$0xf] %vm85_vm1, %v110_v31 }
 0x14a   :  { %152 = shalt.err (!%p149_p9)
}
 0x14b   :  { %s169_s2 = smov 64   ;;  %s170_s24 = smov 4  }
 0x14c   :  { %99 = dma.vmem_to_hbm [thread:$0]  %s94_s23, 128, %s210_s3, [#allocation4], %s169_s2, %s169_s2, %s170_s24  }
 0x14d   :  { %163 = dma.done.wait [#allocation4], 128  }
 0x14e   :  { %164 = vsyncadd [#allocation4], 4294967168 }
 0x14f   :  { %103 = vsyncpa [#allocation3], 1 }
 0x150   :  { %104 = vsyncpa [#allocation4], 1 }

</bundles_post_ra>
